<compile_context>
chip_gen: v5e
topology: v5e:2x2
jax: 0.10.0
libtpu: 0.0.40
codegen_flags: <defaults>
</compile_context>

<pallas_src>
import functools

import jax
import jax.numpy as jnp
from jax.experimental import pallas as pl
from jax.experimental.pallas import tpu as pltpu


def _downsample_add_kernel(feat_ref, w_ref, bias_ref, x_ref, o_ref):
    # feat_ref: (C_in_p, TP)    strided-subsampled feature pixels (native dtype)
    # w_ref   : (C_out_p, C_in_p) 1x1 conv weight with BN scale folded in
    # bias_ref: (C_out_p, 1)    folded BN bias = beta - mean * scale      (f32)
    # x_ref   : (C_out_p, TP)   residual tile (native dtype)
    # o_ref   : (C_out_p, TP)
    conv = jnp.dot(w_ref[...], feat_ref[...], preferred_element_type=jnp.float32)
    identity = conv + bias_ref[...]                      # lane-broadcast bias
    o_ref[...] = (x_ref[...].astype(jnp.float32) + identity).astype(o_ref.dtype)


def _round_up(x, m):
    return ((x + m - 1) // m) * m


def _vmem_limit_bytes():
    """Generation-aware VMEM limit with headroom (v7x: 64 MiB, v5e/v6e: 128 MiB)."""
    try:
        cap = int(pltpu.get_tpu_info().vmem_capacity_bytes)
    except Exception:
        cap = 64 * 1024 * 1024          # conservative (v7x-sized) fallback
    return min((cap * 3) // 4, 96 * 1024 * 1024)


def _step_bytes(tp, c_in_p, c_out_p, itemsize):
    """Honest per-grid-step VMEM footprint estimate."""
    io = 2 * tp * (c_in_p + 2 * c_out_p) * itemsize   # feat + x + out, double-buffered
    wgt = 2 * c_in_p * c_out_p * itemsize             # weight (BlockSpec double-buffers)
    bias = 2 * c_out_p * 4
    tmp = 2 * c_out_p * tp * 4                        # f32 conv result + add temporary
    return io + wgt + bias + tmp


def _choose_p_tiling(hw, n, c_in_p, c_out_p, itemsize, budget):
    """Return (p_padded, tile_p).  Prefers no padding; tiles only when legal."""
    def fits(tp):
        return _step_bytes(tp, c_in_p, c_out_p, itemsize) <= budget

    if hw % 128 == 0:
        divs = sorted((d for d in range(128, hw + 1, 128) if hw % d == 0),
                      reverse=True)
        cands = [d for d in divs if fits(d)] or [128]
        tp = cands[0]
        if n == 1:                       # keep >= 2 grid steps for v7x megacore
            smaller = [d for d in cands if d <= hw // 2]
            if smaller:
                tp = smaller[0]
        return hw, tp

    # Ho*Wo not lane-aligned: a full-dim block is legal and avoids any padding.
    if fits(hw):
        return hw, hw

    # Rare fallback (huge channels * huge spatial): pad P to a lane-aligned tile.
    tp = 128
    for cand in range((hw // 128) * 128, 127, -128):
        if fits(cand):
            tp = cand
            break
    return _round_up(hw, tp), tp


@functools.partial(jax.jit, static_argnames=("stride", "eps"))
def downsample_add(x_nchw, feat_nchw, conv_w, bn_gamma, bn_beta, bn_mean, bn_var,
                   *, stride=2, eps=1e-5):
    """x + BatchNorm(Conv2d_1x1_stride(feat)), NCHW in/out, eval-mode BN."""
    n, c_in, h, w = feat_nchw.shape
    c_out = conv_w.shape[0]
    ho, wo = -(-h // stride), -(-w // stride)
    assert x_nchw.shape == (n, c_out, ho, wo)

    out_dtype = x_nchw.dtype
    mm_dtype = feat_nchw.dtype
    itemsize = max(jnp.dtype(out_dtype).itemsize, jnp.dtype(mm_dtype).itemsize)
    hw = ho * wo

    # --- glue: stride subsample only (no transposes anywhere) ---------------
    # TODO(synk): with an NHWC producer even this strided slice could fold into
    # the BlockSpec index_map; at the NCHW module boundary one strided read of
    # feat is the minimal remaining glue.
    feat_sub = feat_nchw[:, :, ::stride, ::stride].reshape(n, c_in, hw)
    x_rows = x_nchw.reshape(n, c_out, hw)               # zero-copy view

    # --- fold BN (eval) into the weight (scale) + per-channel bias, in f32 --
    scale = bn_gamma.astype(jnp.float32) * jax.lax.rsqrt(
        bn_var.astype(jnp.float32) + eps)
    bias = (bn_beta.astype(jnp.float32)
            - bn_mean.astype(jnp.float32) * scale).reshape(c_out, 1)
    w_eff = (conv_w.reshape(c_out, c_in).astype(jnp.float32)
             * scale[:, None]).astype(mm_dtype)         # (C_out, C_in), scale folded

    # --- channel padding to sublane multiple (no-op for real ResNet sizes) --
    c_in_p = _round_up(c_in, 8)
    c_out_p = _round_up(c_out, 8)

    budget_limit = _vmem_limit_bytes()
    p_pad, tp = _choose_p_tiling(hw, n, c_in_p, c_out_p, itemsize,
                                 int(budget_limit * 0.85))

    feat_p = jnp.pad(feat_sub, ((0, 0), (0, c_in_p - c_in), (0, p_pad - hw)))
    x_p = jnp.pad(x_rows, ((0, 0), (0, c_out_p - c_out), (0, p_pad - hw)))
    w_p = jnp.pad(w_eff, ((0, c_out_p - c_out), (0, c_in_p - c_in)))
    bias_p = jnp.pad(bias, ((0, c_out_p - c_out), (0, 0)))

    grid = (n, p_pad // tp)

    cost = pl.CostEstimate(
        flops=2 * n * p_pad * c_in_p * c_out_p,
        transcendentals=0,
        bytes_accessed=int((n * p_pad * (c_in_p + 2 * c_out_p)
                            + c_in_p * c_out_p) * itemsize + c_out_p * 4),
    )

    out_rows = pl.pallas_call(
        _downsample_add_kernel,
        out_shape=jax.ShapeDtypeStruct((n, c_out_p, p_pad), out_dtype),
        grid_spec=pltpu.PrefetchScalarGridSpec(
            num_scalar_prefetch=0,
            grid=grid,
            in_specs=[
                pl.BlockSpec((None, c_in_p, tp), lambda i, j: (i, 0, j)),   # feat
                pl.BlockSpec((c_out_p, c_in_p), lambda i, j: (0, 0)),       # weight
                pl.BlockSpec((c_out_p, 1), lambda i, j: (0, 0)),            # bias
                pl.BlockSpec((None, c_out_p, tp), lambda i, j: (i, 0, j)),  # x
            ],
            out_specs=pl.BlockSpec((None, c_out_p, tp), lambda i, j: (i, 0, j)),
        ),
        compiler_params=pltpu.CompilerParams(
            dimension_semantics=("parallel", "parallel"),
            vmem_limit_bytes=int(budget_limit),
        ),
        cost_estimate=cost,
    )(feat_p, w_p, bias_p, x_p)

    # Output is already in NCHW layout; slicing/reshape below are no-ops when
    # no padding was applied.
    return out_rows[:, :c_out, :hw].reshape(n, c_out, ho, wo)


if __name__ == "__main__":
    def reference(x, feat, conv_w, gamma, beta, mean, var, stride, eps=1e-5):
        feat_s = feat[:, :, ::stride, ::stride]
        c_out, c_in = conv_w.shape[:2]
        conv = jnp.einsum('nchw,oc->nohw', feat_s, conv_w.reshape(c_out, c_in))
        scale = gamma / jnp.sqrt(var + eps)
        ident = (conv * scale[None, :, None, None]
                 + (beta - mean * scale)[None, :, None, None])
        return x + ident

    def make_case(key, n, c_in, c_out, h, w, stride):
        ks = jax.random.split(key, 7)
        ho, wo = -(-h // stride), -(-w // stride)
        feat = jax.random.normal(ks[0], (n, c_in, h, w), dtype=jnp.float32)
        x = jax.random.normal(ks[1], (n, c_out, ho, wo), dtype=jnp.float32)
        conv_w = jax.random.normal(ks[2], (c_out, c_in, 1, 1), dtype=jnp.float32) * 0.1
        gamma = 1.0 + 0.05 * jax.random.normal(ks[3], (c_out,), dtype=jnp.float32)
        beta = 0.05 * jax.random.normal(ks[4], (c_out,), dtype=jnp.float32)
        mean = 0.05 * jax.random.normal(ks[5], (c_out,), dtype=jnp.float32)
        var = jnp.abs(jax.random.normal(ks[6], (c_out,), dtype=jnp.float32)) + 0.5
        return x, feat, conv_w, gamma, beta, mean, var

    key = jax.random.PRNGKey(0)
    k1, k2 = jax.random.split(key)
    cases = [
        (k1, 2, 4, 8, 16, 16, 2),    # P = 64  -> full-dim (unpadded) pixel tile
        (k2, 1, 8, 16, 32, 32, 2),   # P = 256 -> lane-aligned, split into 2 tiles (N=1)
    ]

    for kk, n, c_in, c_out, h, w, s in cases:
        x, feat, conv_w, g, b, m, v = make_case(kk, n, c_in, c_out, h, w, s)
        out = downsample_add(x, feat, conv_w, g, b, m, v, stride=s)
        jax.block_until_ready(out)
        ref = reference(x, feat, conv_w, g, b, m, v, s)
        assert out.shape == ref.shape, "shape mismatch vs reference"
        assert jnp.allclose(out, ref, atol=1e-4, rtol=1e-4), "mismatch vs reference"

    print("KERNEL_OK")
</pallas_src>

<mosaic_0001>
module attributes {stable_mosaic.version = 11 : i64} {
  func.func @_downsample_add_kernel(%arg0: i32, %arg1: i32, %arg2: memref<1x8x64xf32, #tpu.memory_space<vmem>>, %arg3: memref<8x8xf32, #tpu.memory_space<vmem>>, %arg4: memref<8x1xf32, #tpu.memory_space<vmem>>, %arg5: memref<1x8x64xf32, #tpu.memory_space<vmem>>, %arg6: memref<1x8x64xf32, #tpu.memory_space<vmem>>) attributes {dimension_semantics = [#tpu.dimension_semantics<parallel>, #tpu.dimension_semantics<parallel>], iteration_bounds = array<i64: 2, 1>, scalar_prefetch = 0 : i64, scratch_operands = 0 : i64, tpu.core_type = #tpu.core_type<tc>, window_params = [{transform_indices = @transform_0, window_bounds = array<i64: 1, 8, 64>}, {pipeline_mode = #tpu.pipeline_mode<synchronous>, transform_indices = @transform_1, window_bounds = array<i64: 8, 8>}, {pipeline_mode = #tpu.pipeline_mode<synchronous>, transform_indices = @transform_2, window_bounds = array<i64: 8, 1>}, {transform_indices = @transform_3, window_bounds = array<i64: 1, 8, 64>}, {transform_indices = @transform_4, window_bounds = array<i64: 1, 8, 64>}]} {
    %c0 = arith.constant 0 : index
    %c0_0 = arith.constant 0 : index
    %0 = vector.load %arg3[%c0, %c0_0] : memref<8x8xf32, #tpu.memory_space<vmem>>, vector<8x8xf32>
    %c0_1 = arith.constant 0 : index
    %c0_2 = arith.constant 0 : index
    %c0_3 = arith.constant 0 : index
    %1 = vector.load %arg2[%c0_1, %c0_2, %c0_3] : memref<1x8x64xf32, #tpu.memory_space<vmem>>, vector<1x8x64xf32>
    %2 = vector.shape_cast %1 : vector<1x8x64xf32> to vector<8x64xf32>
    %cst = arith.constant dense<0.000000e+00> : vector<8x64xf32>
    %3 = tpu.matmul %0, %2, %cst {dimension_numbers = #tpu.dot_dimension_numbers<[1], [0], [0], [1], [0, 0, 1, 1], [], []>} : vector<8x8xf32>, vector<8x64xf32>, vector<8x64xf32> -> vector<8x64xf32>
    %c0_4 = arith.constant 0 : index
    %c0_5 = arith.constant 0 : index
    %4 = vector.load %arg4[%c0_4, %c0_5] : memref<8x1xf32, #tpu.memory_space<vmem>>, vector<8x1xf32>
    %5 = vector.broadcast %4 : vector<8x1xf32> to vector<8x64xf32>
    %6 = arith.addf %3, %5 : vector<8x64xf32>
    %c0_6 = arith.constant 0 : index
    %c0_7 = arith.constant 0 : index
    %c0_8 = arith.constant 0 : index
    %7 = vector.load %arg5[%c0_6, %c0_7, %c0_8] : memref<1x8x64xf32, #tpu.memory_space<vmem>>, vector<1x8x64xf32>
    %8 = vector.shape_cast %7 : vector<1x8x64xf32> to vector<8x64xf32>
    %9 = arith.addf %8, %6 : vector<8x64xf32>
    %c0_9 = arith.constant 0 : index
    %c0_10 = arith.constant 0 : index
    %c0_11 = arith.constant 0 : index
    %10 = vector.load %arg6[%c0_9, %c0_10, %c0_11] : memref<1x8x64xf32, #tpu.memory_space<vmem>>, vector<1x8x64xf32>
    %11 = vector.shape_cast %10 : vector<1x8x64xf32> to vector<8x64xf32>
    %12 = vector.shape_cast %9 : vector<8x64xf32> to vector<1x8x64xf32>
    tpu.vector_store %arg6[%c0_9, %c0_10, %c0_11], %12 {strides = array<i32>} : memref<1x8x64xf32, #tpu.memory_space<vmem>>, vector<1x8x64xf32>,
    return
  }
  func.func @transform_0(%arg0: i32, %arg1: i32) -> (i32, i32, i32) {
    %c0_i32 = arith.constant 0 : i32
    %c0_i32_0 = arith.constant 0 : i32
    return %arg0, %c0_i32, %arg1 : i32, i32, i32
  }
  func.func @transform_1(%arg0: i32, %arg1: i32) -> (i32, i32) {
    %c0_i32 = arith.constant 0 : i32
    %c0_i32_0 = arith.constant 0 : i32
    %c0_i32_1 = arith.constant 0 : i32
    return %c0_i32, %c0_i32_0 : i32, i32
  }
  func.func @transform_2(%arg0: i32, %arg1: i32) -> (i32, i32) {
    %c0_i32 = arith.constant 0 : i32
    %c0_i32_0 = arith.constant 0 : i32
    %c0_i32_1 = arith.constant 0 : i32
    return %c0_i32, %c0_i32_0 : i32, i32
  }
  func.func @transform_3(%arg0: i32, %arg1: i32) -> (i32, i32, i32) {
    %c0_i32 = arith.constant 0 : i32
    %c0_i32_0 = arith.constant 0 : i32
    return %arg0, %c0_i32, %arg1 : i32, i32, i32
  }
  func.func @transform_4(%arg0: i32, %arg1: i32) -> (i32, i32, i32) {
    %c0_i32 = arith.constant 0 : i32
    %c0_i32_0 = arith.constant 0 : i32
    return %arg0, %c0_i32, %arg1 : i32, i32, i32
  }
}

</mosaic_0001>

<bundles_post_ra>
// kernel: downsample_add.1
= control target key start
LH: loop header
LB: loop body
LE: loop exit
PB: predicated region body
PF: predicated region fallthrough
CT: control target
= control target key end

     0   :  { %s464_s15 = smov 0   ;;  %s466_s16 = smov 0   ;;  %s503_s0 = inlined_call_operand.vmem [shape: f32[2,8,64], index: 0, kind: input, shape index: {}]   ;;  %s504_s1 = inlined_call_operand.vmem [shape: f32[8,8], index: 1, kind: input, shape index: {}]   ;;  %s505_s2 = inlined_call_operand.vmem [shape: f32[8,1], index: 2, kind: input, shape index: {}]   ;;  %s506_s3 = inlined_call_operand.vmem [shape: f32[2,8,64], index: 3, kind: input, shape index: {}]   ;;  %s507_s4 = inlined_call_operand.vmem [shape: f32[2,8,64], index: 4, kind: output, shape index: {}]  }
   0x1   :  { %s468_s17 = smov 0  }
   0x2 LB: > { %s26_s18 = sadd.s32 1, %s432_s16  ;;  %p381_p0 = scmp.ge.s32.totalorder %s436_s17, 1  ;;  %s436_s17 = sphi %s468_s17, %s14_s17   ;;  %s432_s16 = sphi %s466_s16, %s509_s16   ;;  %s428_s15 = sphi %s464_s15, %s508_s15  }
   0x3   : > { %p28_p1 = scmp.ge.s32.totalorder %s26_s18, 2  ;;  %p194_p2 = scmp.lt.s32.totalorder %s436_s17, 3 }
   0x5   : > { %s511_s18 = smov (%p28_p1, %s26_s18), 0  ;;  %p195_p3 = pnand %p381_p0, %p194_p2 }
   0x6   : > { %p231_p4 = scmp.lt.s32.totalorder (!%p195_p3), %s428_s15, 1 }
   0x7   : > { %198 = sbr.rel (%p195_p3) target bundleno = 148 (0x94), region = 36 }
   0xc   : > { %v254_v0 = vld [vmem:[%s505_s2] sm:$0xff]  ;;  %v438_v1 = vmov 0   ;;  %s513_s15 = smov (!%p231_p4, %s428_s15), 1  ;;  %vm260_vm0 = vcmask 64512   ;;  %vm286_vm1 = vcmask 523264  }
   0xd   : > { %413 = vset.pattern.permute.xlu0 %v438_v1  ;;  %s382_s21 = sshll.u32 %s513_s15, 3  ;;  %v252_v2 = vld [vmem:[%s504_s1] sm:$0xff] }
   0xe   : > { %257 = vperm.xlu0 %413, %v254_v0   ;;  %s237_s24 = scalar_lea.vmem %s503_s0, %s382_s21  ;;  %s244_s29 = scalar_lea.vmem %s506_s3, %s382_s21 }
   0xf   : > { %v253_v3 = vld [vmem:[%s237_s24] sm:$0xff]  ;;  %s251_s6 = scalar_lea.vmem %s507_s4, %s382_s21 }
  0x10   : > { %279 = vmatpush.msra.mxu0 %v253_v3  ;;  %v284_v6 = vld [vmem:[%s244_s29] sm:$0xff] }
  0x11   : > { %385 = vmatmul.msk.f32.vlgmr.msra.gmra.mxu0 %vm260_vm0, %v252_v2 }
  0x80   : > { %v258_v4 = vpop.permute.xlu0 %257 }
  0x8e   : > { %v281_v5 = vpop.f32.mrf.mxu0 }
  0x8f   : > { %v282_v7 = vadd.f32 %v281_v5, %v258_v4 }
  0x91   : > { %v285_v8 = vadd.f32 %v284_v6, %v282_v7 }
  0x93   : > { %287 = vst.msk [vmem:[%s251_s6] sm:$0xff] %vm286_vm1, %v285_v8 }
  0x94 PF: > { %s14_s17 = sadd.s32 1, %s436_s17   ;;  %s508_s15 = smov %s432_s16 }
  0x95   : > { %p11_p5 = scmp.ge.s32.totalorder %s14_s17, 4   ;;  %s509_s16 = smov %s511_s18 }
  0x97   :  { %13 = sbr.rel (!%p11_p5) target bundleno = 2 (0x2), region = 69 }

</bundles_post_ra>
